<compile_context>
chip_gen: v5e
topology: v5e:2x2
jax: 0.10.0
libtpu: 0.0.40
codegen_flags: <defaults>
</compile_context>

<pallas_src>
import functools

import jax
import jax.numpy as jnp
from jax.experimental import pallas as pl
from jax.experimental.pallas import tpu as pltpu


def _channel_attention_kernel(x_ref, wt_ref, b_ref, o_ref, sum_acc, max_acc,
                              *, hw_total, hw_tile):
    """One (batch_tile, hw_tile) grid step of the fused avg+max 1x1-conv.

    x_ref:   (Bt, C, hw_tile)   input tile (native dtype)
    wt_ref:  (C, Cout)          pre-transposed 1x1 conv weight (f32)
    b_ref:   (1, Cout)          bias (f32)
    o_ref:   (Bt, Cout)         output tile (resident across the hw axis)
    sum_acc: (Bt, C, hw_tile)   f32 per-lane running sum
    max_acc: (Bt, C, hw_tile)   f32 per-lane running max
    """
    k = pl.program_id(1)
    k_last = pl.num_programs(1) - 1

    @pl.when(k == 0)
    def _init():
        sum_acc[...] = jnp.zeros_like(sum_acc)
        max_acc[...] = jnp.full_like(max_acc, -jnp.inf)

    x = x_ref[...].astype(jnp.float32)  # accumulate in f32 regardless of input dtype

    if hw_total % hw_tile != 0:
        # Mask the ragged tail so mean / max stay exact (sum: pad 0, max: pad -inf).
        idx = jax.lax.broadcasted_iota(jnp.int32, x.shape, dimension=2)
        valid = (idx + k * hw_tile) < hw_total
        x_for_sum = jnp.where(valid, x, 0.0)
        x_for_max = jnp.where(valid, x, -jnp.inf)
    else:
        x_for_sum = x
        x_for_max = x

    # Element-wise per-lane accumulation: VPU-only work in the streaming loop.
    sum_acc[...] = sum_acc[...] + x_for_sum
    max_acc[...] = jnp.maximum(max_acc[...], x_for_max)

    @pl.when(k == k_last)
    def _finalize():
        # Single cross-lane reduce at the end of the stream.
        avg = jnp.sum(sum_acc[...], axis=-1) * (1.0 / float(hw_total))  # (Bt, C)
        mx = jnp.max(max_acc[...], axis=-1)                             # (Bt, C)
        # conv1(avg_pool(x)) + conv1(max_pool(x)) == (avg + max) @ W^T + 2*b
        s = avg + mx
        out = jnp.dot(s, wt_ref[...], preferred_element_type=jnp.float32)
        out = out + 2.0 * b_ref[...]
        o_ref[...] = out.astype(o_ref.dtype)


def channel_attention(x_nchw, weight, bias, *, hw_tile=None):
    """ChannelAttention (ratio=0) forward.

    x_nchw: (B, C, H, W)  activation (streamed in its native dtype)
    weight: (Cout, Cin)   1x1 conv weight
    bias:   (Cout,)       1x1 conv bias
    Returns (B, Cout, 1, 1) float32, matching the PyTorch module output shape.
    """
    B, C, H, W = x_nchw.shape
    Cout, Cin = weight.shape
    assert Cin == C, "weight in_channels must match x channels"
    HW = H * W

    x3 = x_nchw.reshape(B, C, HW)                     # no dtype upcast: stream native bytes
    wt = jnp.transpose(weight).astype(jnp.float32)    # (Cin, Cout): transpose once, at trace time
    b2 = bias.reshape(1, Cout).astype(jnp.float32)

    elt = x3.dtype.itemsize

    # HW tile: multiple of 128 (or the full HW for small maps), sized conservatively
    # so the same tile fits v7x's smaller (64 MiB physical / 32 MiB scoped) VMEM.
    if hw_tile is None:
        if HW <= 512:
            hw_tile = HW
        else:
            budget = 4 << 20                           # ~4 MiB per streamed x tile
            lanes = max(128, (budget // max(1, B * C * elt)) // 128 * 128)
            hw_tile = int(min(lanes, (HW // 128) * 128))
    grid_hw = pl.cdiv(HW, hw_tile)

    # Batch tiling: this grid axis is marked "parallel" (shards across the 2 TCs on v7x).
    if B > 8 and B % 8 == 0:
        b_tile = 8
    else:
        b_tile = B
    grid_b = B // b_tile

    # VMEM budget: double-buffered input tile + two f32 accumulators + small operands.
    x_tile_bytes = 2 * b_tile * C * hw_tile * elt
    acc_bytes = 2 * b_tile * max(C, 8) * hw_tile * 4
    misc_bytes = (wt.size + b2.size + B * Cout) * 4
    vmem_limit = int(min(max(2 * (x_tile_bytes + acc_bytes + misc_bytes), 8 << 20), 32 << 20))

    cost = pl.CostEstimate(
        flops=2 * B * C * HW + 2 * B * C * Cout,
        transcendentals=0,
        bytes_accessed=B * C * HW * elt + (wt.size + b2.size) * 4 + B * Cout * 4,
    )

    kernel = functools.partial(_channel_attention_kernel, hw_total=HW, hw_tile=hw_tile)

    out = pl.pallas_call(
        kernel,
        out_shape=jax.ShapeDtypeStruct((B, Cout), jnp.float32),
        grid_spec=pltpu.PrefetchScalarGridSpec(
            num_scalar_prefetch=0,
            grid=(grid_b, grid_hw),
            in_specs=[
                pl.BlockSpec((b_tile, C, hw_tile), lambda b, k: (b, 0, k)),
                pl.BlockSpec((C, Cout), lambda b, k: (0, 0)),
                pl.BlockSpec((1, Cout), lambda b, k: (0, 0)),
            ],
            out_specs=pl.BlockSpec((b_tile, Cout), lambda b, k: (b, 0)),
            scratch_shapes=[
                pltpu.VMEM((b_tile, C, hw_tile), jnp.float32),   # running sum
                pltpu.VMEM((b_tile, C, hw_tile), jnp.float32),   # running max
            ],
        ),
        compiler_params=pltpu.CompilerParams(
            dimension_semantics=("parallel", "arbitrary"),
            vmem_limit_bytes=vmem_limit,
        ),
        cost_estimate=cost,
    )(x3, wt, b2)

    return out.reshape(B, Cout, 1, 1)


if __name__ == "__main__":
    # Small shapes consistent with the module: batch=2, in_channels=4, spatial=16x16.
    B, Cin, H, W = 2, 4, 16, 16
    Cout = 4  # out_channel

    key = jax.random.PRNGKey(0)
    kx, kw, kb = jax.random.split(key, 3)

    x = jax.random.normal(kx, (B, Cin, H, W), dtype=jnp.float32)
    # Deterministic Conv2d(in_channel, out_channel, 1) parameters (synthetic init).
    weight = jax.random.normal(kw, (Cout, Cin), dtype=jnp.float32) * 0.1
    bias = jax.random.normal(kb, (Cout,), dtype=jnp.float32) * 0.1

    # hw_tile=128 forces a 2-step streamed reduction, so the init / accumulate /
    # finalize path is exercised even at this small spatial size.
    out = channel_attention(x, weight, bias, hw_tile=128)
    jax.block_until_ready(out)

    # Pure-JAX reference for sanity check.
    avg = jnp.mean(x, axis=(2, 3))                 # (B, Cin)
    mx = jnp.max(x, axis=(2, 3))                   # (B, Cin)
    ref = (avg @ weight.T + bias) + (mx @ weight.T + bias)
    ref = ref.reshape(B, Cout, 1, 1)
    assert jnp.allclose(out, ref, atol=1e-5, rtol=1e-5), "mismatch vs reference"

    # TODO(synk): ratio > 0 branch (conv1 -> ReLU -> conv2) not implemented since
    # the module default ratio=0 uses only the single 1x1 conv path.
    print("KERNEL_OK")
</pallas_src>

<mosaic_0001>
module attributes {stable_mosaic.version = 11 : i64} {
  func.func @_channel_attention_kernel(%arg0: i32, %arg1: i32, %arg2: memref<2x4x128xf32, #tpu.memory_space<vmem>>, %arg3: memref<4x4xf32, #tpu.memory_space<vmem>>, %arg4: memref<1x4xf32, #tpu.memory_space<vmem>>, %arg5: memref<2x4xf32, #tpu.memory_space<vmem>>, %arg6: memref<2x4x128xf32, #tpu.memory_space<vmem>>, %arg7: memref<2x4x128xf32, #tpu.memory_space<vmem>>) attributes {dimension_semantics = [#tpu.dimension_semantics<parallel>, #tpu.dimension_semantics<arbitrary>], iteration_bounds = array<i64: 1, 2>, scalar_prefetch = 0 : i64, scratch_operands = 2 : i64, tpu.core_type = #tpu.core_type<tc>, window_params = [{transform_indices = @transform_0, window_bounds = array<i64: 2, 4, 128>}, {pipeline_mode = #tpu.pipeline_mode<synchronous>, transform_indices = @transform_1, window_bounds = array<i64: 4, 4>}, {pipeline_mode = #tpu.pipeline_mode<synchronous>, transform_indices = @transform_2, window_bounds = array<i64: 1, 4>}, {transform_indices = @transform_3, window_bounds = array<i64: 2, 4>}]} {
    %c0_i32 = arith.constant 0 : i32
    %0 = arith.cmpi eq, %arg1, %c0_i32 : i32
    %1 = arith.extui %0 : i1 to i32
    %c0_i32_0 = arith.constant 0 : i32
    %2 = arith.cmpi ne, %1, %c0_i32_0 : i32
    scf.if %2 {
      %cst = arith.constant 0.000000e+00 : f32
      %13 = vector.broadcast %cst : f32 to vector<2x4x128xf32>
      %c0_16 = arith.constant 0 : index
      %c0_17 = arith.constant 0 : index
      %c0_18 = arith.constant 0 : index
      %14 = vector.load %arg6[%c0_16, %c0_17, %c0_18] : memref<2x4x128xf32, #tpu.memory_space<vmem>>, vector<2x4x128xf32>
      tpu.vector_store %arg6[%c0_16, %c0_17, %c0_18], %13 {strides = array<i32>} : memref<2x4x128xf32, #tpu.memory_space<vmem>>, vector<2x4x128xf32>,
      %cst_19 = arith.constant 0xFF800000 : f32
      %15 = vector.broadcast %cst_19 : f32 to vector<2x4x128xf32>
      %c0_20 = arith.constant 0 : index
      %c0_21 = arith.constant 0 : index
      %c0_22 = arith.constant 0 : index
      %16 = vector.load %arg7[%c0_20, %c0_21, %c0_22] : memref<2x4x128xf32, #tpu.memory_space<vmem>>, vector<2x4x128xf32>
      tpu.vector_store %arg7[%c0_20, %c0_21, %c0_22], %15 {strides = array<i32>} : memref<2x4x128xf32, #tpu.memory_space<vmem>>, vector<2x4x128xf32>,
    } else {
    }
    %c0 = arith.constant 0 : index
    %c0_1 = arith.constant 0 : index
    %c0_2 = arith.constant 0 : index
    %3 = vector.load %arg2[%c0, %c0_1, %c0_2] : memref<2x4x128xf32, #tpu.memory_space<vmem>>, vector<2x4x128xf32>
    %c0_3 = arith.constant 0 : index
    %c0_4 = arith.constant 0 : index
    %c0_5 = arith.constant 0 : index
    %4 = vector.load %arg6[%c0_3, %c0_4, %c0_5] : memref<2x4x128xf32, #tpu.memory_space<vmem>>, vector<2x4x128xf32>
    %5 = arith.addf %4, %3 : vector<2x4x128xf32>
    %c0_6 = arith.constant 0 : index
    %c0_7 = arith.constant 0 : index
    %c0_8 = arith.constant 0 : index
    %6 = vector.load %arg6[%c0_6, %c0_7, %c0_8] : memref<2x4x128xf32, #tpu.memory_space<vmem>>, vector<2x4x128xf32>
    tpu.vector_store %arg6[%c0_6, %c0_7, %c0_8], %5 {strides = array<i32>} : memref<2x4x128xf32, #tpu.memory_space<vmem>>, vector<2x4x128xf32>,
    %c0_9 = arith.constant 0 : index
    %c0_10 = arith.constant 0 : index
    %c0_11 = arith.constant 0 : index
    %7 = vector.load %arg7[%c0_9, %c0_10, %c0_11] : memref<2x4x128xf32, #tpu.memory_space<vmem>>, vector<2x4x128xf32>
    %8 = arith.maximumf %7, %3 : vector<2x4x128xf32>
    %c0_12 = arith.constant 0 : index
    %c0_13 = arith.constant 0 : index
    %c0_14 = arith.constant 0 : index
    %9 = vector.load %arg7[%c0_12, %c0_13, %c0_14] : memref<2x4x128xf32, #tpu.memory_space<vmem>>, vector<2x4x128xf32>
    tpu.vector_store %arg7[%c0_12, %c0_13, %c0_14], %8 {strides = array<i32>} : memref<2x4x128xf32, #tpu.memory_space<vmem>>, vector<2x4x128xf32>,
    %c1_i32 = arith.constant 1 : i32
    %10 = arith.cmpi eq, %arg1, %c1_i32 : i32
    %11 = arith.extui %10 : i1 to i32
    %c0_i32_15 = arith.constant 0 : i32
    %12 = arith.cmpi ne, %11, %c0_i32_15 : i32
    scf.if %12 {
      %c0_16 = arith.constant 0 : index
      %c0_17 = arith.constant 0 : index
      %c0_18 = arith.constant 0 : index
      %13 = vector.load %arg6[%c0_16, %c0_17, %c0_18] : memref<2x4x128xf32, #tpu.memory_space<vmem>>, vector<2x4x128xf32>
      %cst = arith.constant dense<0.000000e+00> : vector<2x4xf32>
      %14 = vector.multi_reduction <add>, %13, %cst [2] : vector<2x4x128xf32> to vector<2x4xf32>
      %cst_19 = arith.constant 3.906250e-03 : f32
      %15 = vector.broadcast %cst_19 : f32 to vector<2x4xf32>
      %16 = arith.mulf %14, %15 : vector<2x4xf32>
      %c0_20 = arith.constant 0 : index
      %c0_21 = arith.constant 0 : index
      %c0_22 = arith.constant 0 : index
      %17 = vector.load %arg7[%c0_20, %c0_21, %c0_22] : memref<2x4x128xf32, #tpu.memory_space<vmem>>, vector<2x4x128xf32>
      %cst_23 = arith.constant dense<0xFF800000> : vector<2x4xf32>
      %18 = vector.multi_reduction <maximumf>, %17, %cst_23 [2] : vector<2x4x128xf32> to vector<2x4xf32>
      %19 = arith.addf %16, %18 : vector<2x4xf32>
      %c0_24 = arith.constant 0 : index
      %c0_25 = arith.constant 0 : index
      %20 = vector.load %arg3[%c0_24, %c0_25] : memref<4x4xf32, #tpu.memory_space<vmem>>, vector<4x4xf32>
      %cst_26 = arith.constant dense<0.000000e+00> : vector<2x4xf32>
      %21 = tpu.matmul %19, %20, %cst_26 {dimension_numbers = #tpu.dot_dimension_numbers<[1], [0], [0], [1], [0, 0, 1, 1], [], []>} : vector<2x4xf32>, vector<4x4xf32>, vector<2x4xf32> -> vector<2x4xf32>
      %c0_27 = arith.constant 0 : index
      %c0_28 = arith.constant 0 : index
      %22 = vector.load %arg4[%c0_27, %c0_28] : memref<1x4xf32, #tpu.memory_space<vmem>>, vector<1x4xf32>
      %cst_29 = arith.constant 2.000000e+00 : f32
      %23 = vector.broadcast %cst_29 : f32 to vector<1x4xf32>
      %24 = arith.mulf %23, %22 : vector<1x4xf32>
      %25 = vector.broadcast %24 : vector<1x4xf32> to vector<2x4xf32>
      %26 = arith.addf %21, %25 : vector<2x4xf32>
      %c0_30 = arith.constant 0 : index
      %c0_31 = arith.constant 0 : index
      %27 = vector.load %arg5[%c0_30, %c0_31] : memref<2x4xf32, #tpu.memory_space<vmem>>, vector<2x4xf32>
      tpu.vector_store %arg5[%c0_30, %c0_31], %26 {strides = array<i32>} : memref<2x4xf32, #tpu.memory_space<vmem>>, vector<2x4xf32>,
    } else {
    }
    return
  }
  func.func @transform_0(%arg0: i32, %arg1: i32) -> (i32, i32, i32) {
    %c0_i32 = arith.constant 0 : i32
    %c0_i32_0 = arith.constant 0 : i32
    return %arg0, %c0_i32, %arg1 : i32, i32, i32
  }
  func.func @transform_1(%arg0: i32, %arg1: i32) -> (i32, i32) {
    %c0_i32 = arith.constant 0 : i32
    %c0_i32_0 = arith.constant 0 : i32
    %c0_i32_1 = arith.constant 0 : i32
    return %c0_i32, %c0_i32_0 : i32, i32
  }
  func.func @transform_2(%arg0: i32, %arg1: i32) -> (i32, i32) {
    %c0_i32 = arith.constant 0 : i32
    %c0_i32_0 = arith.constant 0 : i32
    %c0_i32_1 = arith.constant 0 : i32
    return %c0_i32, %c0_i32_0 : i32, i32
  }
  func.func @transform_3(%arg0: i32, %arg1: i32) -> (i32, i32) {
    %c0_i32 = arith.constant 0 : i32
    %c0_i32_0 = arith.constant 0 : i32
    return %arg0, %c0_i32 : i32, i32
  }
}

</mosaic_0001>

<bundles_post_ra>
// kernel: tpu_custom_call.1
= control target key start
LH: loop header
LB: loop body
LE: loop exit
PB: predicated region body
PF: predicated region fallthrough
CT: control target
= control target key end

     0   :  { %8 = vsyncpa [#allocation5], 0  ;;  %s785_s0 = inlined_call_operand.hbm [shape: f32[2,4,256], index: 0, kind: input, shape index: {}]   ;;  %s786_s1 = inlined_call_operand.hbm [shape: f32[4,4], index: 1, kind: input, shape index: {}]   ;;  %s787_s2 = inlined_call_operand.vmem [shape: f32[1,4], index: 2, kind: input, shape index: {}]   ;;  %s788_s3 = inlined_call_operand.hbm [shape: f32[2,4], index: 3, kind: output, shape index: {}]  }
   0x1   :  { %10 = vsyncpa [#allocation5 + $0x1], 0 }
   0x2   :  { %11 = vsyncpa [#allocation8], 0 }
   0x3   :  { %12 = vsyncpa [#allocation6], 0  ;;  %s659_s12 = smov 0   ;;  %s661_s13 = smov 0  }
   0x4   :  { %s663_s14 = smov 0   ;;  %s665_s15 = smov 0  }
   0x5   :  { %s667_s16 = smov 0   ;;  %s669_s17 = smov 0  }
   0x6 LB: > { %s389_s18 = sadd.s32 4294967295, %s630_s17   ;;  %s39_s19 = sadd.s32 1, %s618_s14  ;;  %s630_s17 = sphi %s669_s17, %s18_s17   ;;  %s626_s16 = sphi %s667_s16, %s798_s16   ;;  %s622_s15 = sphi %s665_s15, %s797_s15   ;;  %s618_s14 = sphi %s663_s14, %s796_s14   ;;  %s614_s13 = sphi %s661_s13, %s795_s13   ;;  %s610_s12 = sphi %s659_s12, %s794_s12  }
   0x7   : > { %p46_p0 = scmp.ne.s32.totalorder %s618_s14, %s614_s13  ;;  %p47_p1 = scmp.eq.s32.totalorder %s630_s17, 0 }
   0x8   : > { %p52_p2 = scmp.ne.s32.totalorder %s614_s13, %s610_s12  ;;  %p695_p3 = scmp.eq.s32.totalorder %s389_s18, 0 }
   0x9   : > { %p699_p4 = por %p47_p1, %p46_p0  ;;  %p390_p5 = scmp.ge.s32.totalorder %s630_s17, 1 }
   0xa   : > { %p706_p6 = por %p695_p3, %p52_p2  ;;  %p131_p7 = scmp.lt.s32.totalorder %s630_s17, 3 }
   0xb   : > { %s143_s25 = sshll.u32 %s786_s1, 4  ;;  %s632_s27 = smov [#allocation7]   ;;  %s144_s25 = int_to_ptr.hbm [resolvable:$true] %s143_s25 }
   0xc   : > { %p714_p8 = pnand %p390_p5, %p131_p7  ;;  %s145_s28 = sshll.u32 %s632_s27, 4  ;;  %s146_s28 = int_to_ptr.vmem [resolvable:$true] %s145_s28 }
   0xd   : > { %p425_p10 = scmp.lt.s32.totalorder %s630_s17, 2  ;;  %s27_s30 = sadd.s32 1, %s626_s16 }
   0xe   : > { %p416_p9 = pneg %p714_p8  ;;  %p28_p13 = scmp.ge.s32.totalorder %s27_s30, 2 }
   0xf   : > { %p725_p12 = pnand %p425_p10, %p699_p4  ;;  %s159_s4 = sand.u32 1, %s618_s14  }
  0x10   : > { %p417_p11 = pnand %p416_p9, %p695_p3  ;;  %s394_s5 = sshll.u32 %s626_s16, 2 }
  0x11   : > { %s800_s30 = smov (%p28_p13, %s27_s30), 0  ;;  %s393_s6 = sshll.u32 %s159_s4, 3 }
  0x12   : > { %419 = dma.hbm_to_vmem [thread:$0]  (!%p417_p11), %s144_s25, 64, %s146_s28, [#allocation8]  }
  0x13   : > { %s35_s7 = ssub.s32 %s626_s16, %s800_s30  ;;  %s170_s10 = scalar_lea.hbm %s785_s0, %s394_s5 }
  0x14   : > { %p37_p0 = scmp.eq.s32.totalorder %s35_s7, 0  ;;  %s171_s11 = sshll.u32 %s170_s10, 4  ;;  %s172_s11 = int_to_ptr.hbm [resolvable:$true] %s171_s11 }
  0x15   : > { %s163_s12 = scalar_lea.vmem [#allocation4], %s393_s6  ;;  %s160_s24 = scalar_lea.sflag [#allocation5], %s159_s4 }
  0x16   : > { %s173_s21 = sshll.u32 %s163_s12, 4  ;;  %s633_s25 = smov 128   ;;  %s174_s21 = int_to_ptr.vmem [resolvable:$true] %s173_s21 }
  0x17   : > { %s742_s23 = scalar_select %p37_p0, %s618_s14, %s39_s19  }
  0x18   : > { %s634_s27 = smov 64   ;;  %s635_s28 = smov 4  }
  0x19   : > { %423 = dma.hbm_to_vmem [thread:$0]  (!%p725_p12), %s172_s11, 128, %s174_s21, %s160_s24, %s633_s25, %s634_s27, %s635_s28  }
  0x1a   : > { %185 = sbr.rel (%p714_p8) target bundleno = 327 (0x147), region = 32  ;;  %s187_s5 = sand.u32 (!%p714_p8), 1, %s614_s13  }
  0x1b   : > { %s396_s7 = sshll.u32 (!%p714_p8), %s187_s5, 3  ;;  %s188_s6 = scalar_lea.sflag (!%p714_p8), [#allocation5], %s187_s5 }
  0x1c   : > { %s191_s8 = scalar_lea.vmem (!%p714_p8), [#allocation4], %s396_s7 }
  0x1f   : > { %597 = dma.done.wait (%p706_p6), %s188_s6, 128  }
  0x20   : > { %599 = vsyncadd (%p706_p6), %s188_s6, 4294967168 }
  0x21   : > { %601 = dma.done.wait (%p695_p3), [#allocation8], 64  }
  0x22   : > { %603 = vsyncadd (%p695_p3), [#allocation8], 4294967232  ;;  %p398_p1 = scmp.ne.s32.totalorder %s622_s15, 0 }
  0x24   : > { %219 = sbr.rel (%p398_p1) target bundleno = 46 (0x2e), region = 44 }
  0x29   : > { %v636_v0 = vmov 0.0   ;;  %v637_v1 = vmov -inf  }
  0x2a   : > { %220 = vst [vmem:[#allocation2] sm:$0xf] %v636_v0 }
  0x2b   : > { %221 = vst [vmem:[#allocation2 + $0x4] sm:$0xf] %v636_v0 }
  0x2c   : > { %222 = vst [vmem:[#allocation3] sm:$0xf] %v637_v1 }
  0x2d   : > { %223 = vst [vmem:[#allocation3 + $0x4] sm:$0xf] %v637_v1 }
  0x2e PF: > { %v224_v2 = vld [vmem:[%s191_s8] sm:$0xf]  ;;  %v225_v4 = vld [vmem:[%s191_s8 + $0x4] sm:$0xf]  ;;  %p399_p2 = scmp.ne.s32.totalorder %s622_s15, 1 }
  0x31   : > { %v226_v3 = vld [vmem:[#allocation2] sm:$0xf] }
  0x32   : > { %v228_v5 = vadd.f32 %v226_v3, %v224_v2  ;;  %v227_v6 = vld [vmem:[#allocation2 + $0x4] sm:$0xf] }
  0x33   : > { %v232_v7 = vld [vmem:[#allocation3] sm:$0xf]  ;;  %v229_v9 = vadd.f32 %v227_v6, %v225_v4  ;;  %241 = sbr.rel (%p399_p2) target bundleno = 321 (0x141), region = 48 }
  0x34   : > { %v233_v8 = vld [vmem:[#allocation3 + $0x4] sm:$0xf]  ;;  %v234_v10 = vmax.f32 %v232_v7, %v224_v2  ;;  %230 = vst [vmem:[#allocation2] sm:$0xf] %v228_v5 }
  0x35   : > { %v235_v11 = vmax.f32 %v233_v8, %v225_v4  ;;  %231 = vst [vmem:[#allocation2 + $0x4] sm:$0xf] %v229_v9 }
  0x36   : > { %236 = vst [vmem:[#allocation3] sm:$0xf] %v234_v10 }
  0x37   : > { %237 = vst [vmem:[#allocation3 + $0x4] sm:$0xf] %v235_v11 }
  0x38   : > { %vm244_vm0 = vcmask 1043456   ;;  %v263_v20 = vld [vmem:[#allocation7] sm:$0xf]  ;;  %v271_v24 = vlaneseq  ;;  %vm275_vm1 = vcmask 1041409   ;;  %vm277_vm2 = vcmask 31744  }
  0x39   : > { %400 = vmatpush.msk.msra.mxu0 %vm244_vm0, %v263_v20  ;;  %v264_v34 = vld [vmem:[%s787_s2] sm:$0x1]  ;;  %vm303_vm3 = vcmask 25600  }
  0x3a   : > { %v272_v27 = vand.u32 127, %v271_v24  ;;  %v265_v35 = vmul.f32 2.0, %v264_v34 }
  0x3b   : > { %v242_v12 = vld [vmem:[#allocation2] sm:$0xf] }
  0x3c   : > { %v245_v14 = vsel %vm244_vm0, %v242_v12, 0.0  ;;  %v243_v16 = vld [vmem:[#allocation2 + $0x4] sm:$0xf]  ;;  %v267_v36 = vperm.slane %v265_v35, 0 }
  0x3d   : > { %v253_v13 = vld [vmem:[#allocation3] sm:$0xf]  ;;  %246 = vadd.xlane.f32.xlu0 %v245_v14  ;;  %v248_v18 = vsel %vm244_vm0, %v243_v16, 0.0 }
  0x3e   : > { %v255_v15 = vsel %vm244_vm0, %v253_v13, -inf  ;;  %v254_v17 = vld [vmem:[#allocation3 + $0x4] sm:$0xf] }
  0x3f   : > { %256 = vmax.xlane.f32.xlu1 %v255_v15  ;;  %v258_v19 = vsel %vm244_vm0, %v254_v17, -inf }
  0x45   : > { %249 = vadd.xlane.f32.xlu0 %v248_v18 }
  0x47   : > { %259 = vmax.xlane.f32.xlu1 %v258_v19 }
  0xb0   : > { %v247_v21 = vpop.xlane.xlu0 %246 }
  0xb1   : > { %v251_v23 = vmul.f32 0.00390625, %v247_v21 }
  0xb2   : > { %v257_v22 = vpop.xlane.xlu1 %256 }
  0xb3   : > { %v261_v28 = vadd.f32 %v257_v22, %v251_v23 }
  0xb5   : > { %v273_v31 = vperm.slane %v261_v28, %v272_v27 }
  0xb8   : > { %v250_v25 = vpop.xlane.xlu0 %249 }
  0xb9   : > { %v252_v29 = vmul.f32 0.00390625, %v250_v25 }
  0xba   : > { %v260_v26 = vpop.xlane.xlu1 %259 }
  0xbb   : > { %v262_v30 = vadd.f32 %v260_v26, %v252_v29 }
  0xbd   : > { %v274_v32 = vperm.slane %v262_v30, %v272_v27 }
  0xbf   : > { %v276_v33 = vsel %vm275_vm1, %v274_v32, %v273_v31 }
  0xc0   : > { %401 = vmatmul.msk.f32.vlgmr.msra.gmra.mxu0 %vm277_vm2, %v276_v33 }
 0x13d   : > { %v300_v37 = vpop.f32.mrf.mxu0 }
 0x13e   : > { %v301_v38 = vadd.f32 %v300_v37, %v267_v36 }
 0x140   : > { %304 = vst.msk [vmem:[#allocation9] sm:$0x3] %vm303_vm3, %v301_v38 }
 0x141 PF: > { %p427_p3 = scmp.eq.s32.totalorder %s389_s18, 1  ;;  %s315_s26 = sshll.u32 %s788_s3, 4  ;;  %s316_s26 = int_to_ptr.hbm [resolvable:$true] %s315_s26 }
 0x142   : > { %s638_s29 = smov [#allocation9]  }
 0x143   : > { %s313_s4 = sshll.u32 %s638_s29, 4  ;;  %s314_s4 = int_to_ptr.vmem [resolvable:$true] %s313_s4 }
 0x144   : > { %413 = dma.vmem_to_hbm [thread:$0]  (%p427_p3), %s314_s4, 32, %s316_s26, [#allocation6]  }
 0x145   : > { %605 = dma.done.wait (%p427_p3), [#allocation6], 32  }
 0x146   : > { %607 = vsyncadd (%p427_p3), [#allocation6], 4294967264 }
 0x147 PF: > { %s18_s17 = sadd.s32 1, %s630_s17   ;;  %s794_s12 = smov %s614_s13 }
 0x148   : > { %p15_p4 = scmp.ge.s32.totalorder %s18_s17, 4   ;;  %s795_s13 = smov %s618_s14 }
 0x149   : > { %s796_s14 = smov %s742_s23  ;;  %s797_s15 = smov %s626_s16 }
 0x14a   : > { %s798_s16 = smov %s800_s30  ;;  %17 = sbr.rel (!%p15_p4) target bundleno = 6 (0x6), region = 82 }
 0x14f   :  { %329 = vsyncpa [#allocation5], 1 }
 0x150   :  { %331 = vsyncpa [#allocation5 + $0x1], 1 }
 0x151   :  { %332 = vsyncpa [#allocation8], 1 }
 0x152   :  { %333 = vsyncpa [#allocation6], 1 }
 0x153   :  { %335 = vsyncpa [#allocation6 + $0x1], 1 }

</bundles_post_ra>
